<compile_context>
chip_gen: v7x
topology: tpu7x:2x2x1
jax: 0.10.0
libtpu: 0.0.40
codegen_flags: <defaults>
</compile_context>

<pallas_src>
import jax
import jax.numpy as jnp
from jax.experimental import pallas as pl
from jax.experimental.pallas import tpu as pltpu


# ----------------------------------------------------------------------------
# Recommended forward: plain pass-through (no custom call, no copies).
# ----------------------------------------------------------------------------
def enc_lerp_learned_consts_forward(identity, base_w, delta):
    """Exact equivalent of EncLerpLearnedConsts.forward(): return the params.

    Zero-cost on every TPU generation; lets XLA fuse the constants into the
    downstream lerp consumer (P11-style composition) instead of forcing an
    opaque custom-call boundary.
    """
    return identity, base_w, delta


# ----------------------------------------------------------------------------
# Fallback: materialize fresh output buffers via DMA-only HBM->HBM copies.
# Used only when distinct output buffers are genuinely required.
# ----------------------------------------------------------------------------
def _materialize_kernel(identity_in, base_w_in, delta_in,
                        identity_out, base_w_out, delta_out,
                        sems):
    # All refs live in pl.ANY (HBM); the DMA engines move the bytes without
    # touching VMEM or any TensorCore load/store slot.
    c0 = pltpu.make_async_copy(identity_in, identity_out, sems.at[0])
    c1 = pltpu.make_async_copy(base_w_in, base_w_out, sems.at[1])
    c2 = pltpu.make_async_copy(delta_in, delta_out, sems.at[2])
    # Issue all three, then wait — the copies overlap on the DMA engines.
    c0.start()
    c1.start()
    c2.start()
    c0.wait()
    c1.wait()
    c2.wait()


def enc_lerp_learned_consts_materialize(identity, base_w, delta):
    """Forward that produces physically distinct copies of the params.

    No input_output_aliases (the learned constants are not donated), no
    VMEM pipelining — just three overlapped HBM->HBM DMAs.
    """
    params = (identity, base_w, delta)
    hbm_spec = lambda: pl.BlockSpec(memory_space=pl.ANY)
    return pl.pallas_call(
        _materialize_kernel,
        in_specs=[hbm_spec() for _ in params],
        out_specs=tuple(hbm_spec() for _ in params),
        out_shape=tuple(jax.ShapeDtypeStruct(p.shape, p.dtype) for p in params),
        scratch_shapes=[pltpu.SemaphoreType.DMA((3,))],
    )(*params)


if __name__ == "__main__":
    key = jax.random.PRNGKey(0)
    k_id, k_bw, k_d = jax.random.split(key, 3)

    # Small deterministic "learned constants" (the module accepts arbitrary
    # tensors); lane-friendly (8, 128) f32 shapes.
    identity = jax.random.normal(k_id, (8, 128), dtype=jnp.float32)
    base_w = jax.random.normal(k_bw, (8, 128), dtype=jnp.float32)
    delta = jax.random.normal(k_d, (8, 128), dtype=jnp.float32)

    # 1) Recommended zero-cost pass-through forward.
    out_identity, out_base_w, out_delta = enc_lerp_learned_consts_forward(
        identity, base_w, delta
    )
    assert out_identity.shape == identity.shape and out_identity.dtype == identity.dtype
    assert out_base_w.shape == base_w.shape and out_base_w.dtype == base_w.dtype
    assert out_delta.shape == delta.shape and out_delta.dtype == delta.dtype
    assert jnp.array_equal(out_identity, identity)
    assert jnp.array_equal(out_base_w, base_w)
    assert jnp.array_equal(out_delta, delta)

    # 2) DMA-only Pallas fallback (distinct output buffers), run once on TPU.
    materialize = jax.jit(enc_lerp_learned_consts_materialize)
    m_identity, m_base_w, m_delta = jax.block_until_ready(
        materialize(identity, base_w, delta)
    )
    assert m_identity.shape == identity.shape and m_identity.dtype == identity.dtype
    assert m_base_w.shape == base_w.shape and m_base_w.dtype == base_w.dtype
    assert m_delta.shape == delta.shape and m_delta.dtype == delta.dtype
    assert jnp.array_equal(m_identity, identity)
    assert jnp.array_equal(m_base_w, base_w)
    assert jnp.array_equal(m_delta, delta)

    print("KERNEL_OK")
</pallas_src>

<mosaic_0001>
module attributes {stable_mosaic.version = 11 : i64} {
  func.func @_materialize_kernel(%arg0: memref<8x128xf32, #tpu.memory_space<any>>, %arg1: memref<8x128xf32, #tpu.memory_space<any>>, %arg2: memref<8x128xf32, #tpu.memory_space<any>>, %arg3: memref<8x128xf32, #tpu.memory_space<any>>, %arg4: memref<8x128xf32, #tpu.memory_space<any>>, %arg5: memref<8x128xf32, #tpu.memory_space<any>>, %arg6: memref<3x!tpu.dma_semaphore, #tpu.memory_space<semaphore_mem>>) attributes {dimension_semantics = [], scalar_prefetch = 0 : i64, scratch_operands = 1 : i64, tpu.core_type = #tpu.core_type<tc>} {
    %c0_i32 = arith.constant 0 : i32
    %0 = tpu.memref_slice %arg6[%c0_i32] : memref<3x!tpu.dma_semaphore, #tpu.memory_space<semaphore_mem>> -> memref<1x!tpu.dma_semaphore, #tpu.memory_space<semaphore_mem>>
    %1 = tpu.memref_squeeze %0 : memref<1x!tpu.dma_semaphore, #tpu.memory_space<semaphore_mem>> -> memref<!tpu.dma_semaphore, #tpu.memory_space<semaphore_mem>>
    tpu.enqueue_dma source(%arg0 : memref<8x128xf32, #tpu.memory_space<any>>) target(%arg3 : memref<8x128xf32, #tpu.memory_space<any>>) target_semaphore(%1 : memref<!tpu.dma_semaphore, #tpu.memory_space<semaphore_mem>>)
    %c1_i32 = arith.constant 1 : i32
    %2 = tpu.memref_slice %arg6[%c1_i32] : memref<3x!tpu.dma_semaphore, #tpu.memory_space<semaphore_mem>> -> memref<1x!tpu.dma_semaphore, #tpu.memory_space<semaphore_mem>>
    %3 = tpu.memref_squeeze %2 : memref<1x!tpu.dma_semaphore, #tpu.memory_space<semaphore_mem>> -> memref<!tpu.dma_semaphore, #tpu.memory_space<semaphore_mem>>
    tpu.enqueue_dma source(%arg1 : memref<8x128xf32, #tpu.memory_space<any>>) target(%arg4 : memref<8x128xf32, #tpu.memory_space<any>>) target_semaphore(%3 : memref<!tpu.dma_semaphore, #tpu.memory_space<semaphore_mem>>)
    %c2_i32 = arith.constant 2 : i32
    %4 = tpu.memref_slice %arg6[%c2_i32] : memref<3x!tpu.dma_semaphore, #tpu.memory_space<semaphore_mem>> -> memref<1x!tpu.dma_semaphore, #tpu.memory_space<semaphore_mem>>
    %5 = tpu.memref_squeeze %4 : memref<1x!tpu.dma_semaphore, #tpu.memory_space<semaphore_mem>> -> memref<!tpu.dma_semaphore, #tpu.memory_space<semaphore_mem>>
    tpu.enqueue_dma source(%arg2 : memref<8x128xf32, #tpu.memory_space<any>>) target(%arg5 : memref<8x128xf32, #tpu.memory_space<any>>) target_semaphore(%5 : memref<!tpu.dma_semaphore, #tpu.memory_space<semaphore_mem>>)
    %c0_i32_0 = arith.constant 0 : i32
    %6 = tpu.memref_slice %arg6[%c0_i32_0] : memref<3x!tpu.dma_semaphore, #tpu.memory_space<semaphore_mem>> -> memref<1x!tpu.dma_semaphore, #tpu.memory_space<semaphore_mem>>
    %7 = tpu.memref_squeeze %6 : memref<1x!tpu.dma_semaphore, #tpu.memory_space<semaphore_mem>> -> memref<!tpu.dma_semaphore, #tpu.memory_space<semaphore_mem>>
    tpu.wait_dma2 semaphore(%7 : memref<!tpu.dma_semaphore, #tpu.memory_space<semaphore_mem>>) src(%arg0 : memref<8x128xf32, #tpu.memory_space<any>>) dst(%arg3 : memref<8x128xf32, #tpu.memory_space<any>>)
    %c1_i32_1 = arith.constant 1 : i32
    %8 = tpu.memref_slice %arg6[%c1_i32_1] : memref<3x!tpu.dma_semaphore, #tpu.memory_space<semaphore_mem>> -> memref<1x!tpu.dma_semaphore, #tpu.memory_space<semaphore_mem>>
    %9 = tpu.memref_squeeze %8 : memref<1x!tpu.dma_semaphore, #tpu.memory_space<semaphore_mem>> -> memref<!tpu.dma_semaphore, #tpu.memory_space<semaphore_mem>>
    tpu.wait_dma2 semaphore(%9 : memref<!tpu.dma_semaphore, #tpu.memory_space<semaphore_mem>>) src(%arg1 : memref<8x128xf32, #tpu.memory_space<any>>) dst(%arg4 : memref<8x128xf32, #tpu.memory_space<any>>)
    %c2_i32_2 = arith.constant 2 : i32
    %10 = tpu.memref_slice %arg6[%c2_i32_2] : memref<3x!tpu.dma_semaphore, #tpu.memory_space<semaphore_mem>> -> memref<1x!tpu.dma_semaphore, #tpu.memory_space<semaphore_mem>>
    %11 = tpu.memref_squeeze %10 : memref<1x!tpu.dma_semaphore, #tpu.memory_space<semaphore_mem>> -> memref<!tpu.dma_semaphore, #tpu.memory_space<semaphore_mem>>
    tpu.wait_dma2 semaphore(%11 : memref<!tpu.dma_semaphore, #tpu.memory_space<semaphore_mem>>) src(%arg2 : memref<8x128xf32, #tpu.memory_space<any>>) dst(%arg5 : memref<8x128xf32, #tpu.memory_space<any>>)
    return
  }
}

</mosaic_0001>

<bundles_post_ra>
// kernel: enc_lerp_learned_consts_materialize.1
= control target key start
LH: loop header
LB: loop body
LE: loop exit
PB: predicated region body
PF: predicated region fallthrough
CT: control target
= control target key end

     0   :  { %s95_s18 = smov [#allocation2]   ;;  %s96_s19 = smov [#allocation3]   ;;  %s150_s0 = inlined_call_operand.hbm [shape: f32[8,128], index: 0, kind: input, shape index: {}]   ;;  %s151_s3 = inlined_call_operand.hbm [shape: f32[8,128], index: 3, kind: output, shape index: {0}]   ;;  %s152_s1 = inlined_call_operand.hbm [shape: f32[8,128], index: 1, kind: input, shape index: {}]   ;;  %s153_s4 = inlined_call_operand.hbm [shape: f32[8,128], index: 4, kind: output, shape index: {1}]   ;;  %s154_s2 = inlined_call_operand.hbm [shape: f32[8,128], index: 2, kind: input, shape index: {}]   ;;  %s155_s5 = inlined_call_operand.hbm [shape: f32[8,128], index: 5, kind: output, shape index: {2}]  }
   0x1   :  { %s97_s20 = smov 0   ;;  %s98_s25 = smov [#allocation2 + $0x1]  }
   0x2   :  { %23 = dma.general %s150_s0, 128, %s151_s3, %s95_s18, %s96_s19, [#allocation4], %s97_s20, 0  }
   0x3   :  { %s99_s26 = smov [#allocation5]   ;;  %s100_s6 = smov [#allocation2 + $0x2]  }
   0x4   :  { %37 = dma.general %s152_s1, 128, %s153_s4, %s98_s25, %s99_s26, [#allocation6], %s97_s20, 0  }
   0x5   :  { %s101_s7 = smov [#allocation7]  }
   0x6   :  { %51 = dma.general %s154_s2, 128, %s155_s5, %s100_s6, %s101_s7, [#allocation8], %s97_s20, 0  }
   0x7   :  { %89 = dma.done.wait [#allocation2], 128 }
   0x8   :  { %90 = vsyncadd [#allocation2], 4294967168 }
   0x9   :  { %91 = dma.done.wait [#allocation2 + $0x1], 128 }
   0xa   :  { %92 = vsyncadd [#allocation2 + $0x1], 4294967168 }
   0xb   :  { %93 = dma.done.wait [#allocation2 + $0x2], 128 }
   0xc   :  { %94 = vsyncadd [#allocation2 + $0x2], 4294967168 }
   0xd   :  { %59 = vsyncmov [#allocation2] }
  0x10   :  { %s60_s0 = vpop.sfrf %59 }
  0x11   :  { %p79_p0 = scmp.ne.s32.totalorder %s60_s0, 0 }
  0x13   :  { %64 = shalt.err (%p79_p0)  }
  0x14   :  { %66 = vsyncmov [#allocation2 + $0x1] }
  0x17   :  { %s67_s1 = vpop.sfrf %66 }
  0x18   :  { %p80_p1 = scmp.ne.s32.totalorder %s67_s1, 0 }
  0x1a   :  { %71 = shalt.err (%p80_p1)  }
  0x1b   :  { %73 = vsyncmov [#allocation2 + $0x2] }
  0x1e   :  { %s74_s3 = vpop.sfrf %73 }
  0x1f   :  { %p81_p2 = scmp.ne.s32.totalorder %s74_s3, 0 }
  0x21   :  { %78 = shalt.err (%p81_p2)  }

</bundles_post_ra>
